<compile_context>
chip_gen: v7x
topology: tpu7x:2x2x1
jax: 0.10.0
libtpu: 0.0.40
codegen_flags: <defaults>
</compile_context>

<pallas_src>
import functools

import jax
import jax.numpy as jnp
from jax.experimental import pallas as pl
from jax.experimental.pallas import tpu as pltpu


# ----------------------------------------------------------------------------
# NCHW-native kernel: spatial (H*W) on the 128-lane axis, channels on sublanes.
# Used when C is not a multiple of 128.
# ----------------------------------------------------------------------------
def _peg_kernel_nchw(x_ref, w_ref, b_ref, o_ref, xp_ref, *, H, W, K, LPAD):
    HW = H * W
    P = K // 2
    TC = x_ref.shape[1]

    x = x_ref[0].astype(jnp.float32)        # (TC, HW)
    b = b_ref[...].astype(jnp.float32)      # (TC, 1)

    # Zero only the halo strips; the interior is fully overwritten each step.
    if LPAD > 0:
        xp_ref[:, :LPAD] = jnp.zeros((TC, LPAD), jnp.float32)
        xp_ref[:, LPAD + HW:] = jnp.zeros((TC, LPAD), jnp.float32)
    xp_ref[:, LPAD:LPAD + HW] = x

    # Column index of each flattened spatial position: (1, HW), broadcast over
    # the TC sublanes. Computed in-kernel (no HBM mask input).
    col = jax.lax.broadcasted_iota(jnp.int32, (1, HW), 1) % W

    # Residual + bias folded into the accumulator init.
    acc = x + b

    # Group taps by horizontal offset dw; apply the row-wrap select once per
    # group (vertical out-of-range reads hit the zeroed halo or wrap into a
    # horizontally-invalid column, which this same select kills).
    for dw in range(K):
        d = dw - P
        part = None
        for dh in range(K):
            s = (dh - P) * W + d
            tap = xp_ref[:, LPAD + s:LPAD + s + HW]                      # (TC, HW)
            wk = w_ref[:, dh * K + dw:dh * K + dw + 1].astype(jnp.float32)
            contrib = tap * wk
            part = contrib if part is None else part + contrib
        if d != 0:
            valid = jnp.logical_and(col + d >= 0, col + d < W)           # (1, HW)
            part = jnp.where(valid, part, 0.0)
        acc = acc + part

    o_ref[0] = acc.astype(o_ref.dtype)


# ----------------------------------------------------------------------------
# Channels-last kernel: C on the 128-lane axis, spatial positions on sublanes.
# Taps become aligned sublane-offset slices; stores are fully lane-dense.
# ----------------------------------------------------------------------------
def _peg_kernel_cl(x_ref, w_ref, b_ref, o_ref, xp_ref, *, H, W, K, SPAD):
    HW = H * W
    P = K // 2
    TCc = xp_ref.shape[1]

    x = x_ref[0].astype(jnp.float32)        # (HW, TCc)
    b = b_ref[...].astype(jnp.float32)      # (1, TCc)

    if SPAD > 0:
        xp_ref[:SPAD, :] = jnp.zeros((SPAD, TCc), jnp.float32)
        xp_ref[SPAD + HW:, :] = jnp.zeros((SPAD, TCc), jnp.float32)
    xp_ref[SPAD:SPAD + HW, :] = x

    # Column index of each spatial position along sublanes: (HW, 1).
    col = jax.lax.broadcasted_iota(jnp.int32, (HW, 1), 0) % W

    acc = x + b

    for dw in range(K):
        d = dw - P
        part = None
        for dh in range(K):
            s = (dh - P) * W + d
            tap = xp_ref[SPAD + s:SPAD + s + HW, :]                      # (HW, TCc)
            wk = w_ref[dh * K + dw:dh * K + dw + 1, :].astype(jnp.float32)  # (1, TCc)
            contrib = tap * wk
            part = contrib if part is None else part + contrib
        if d != 0:
            valid = jnp.logical_and(col + d >= 0, col + d < W)           # (HW, 1)
            part = jnp.where(valid, part, 0.0)
        acc = acc + part

    o_ref[0] = acc.astype(o_ref.dtype)


def _pick_tile(C, elems_per_channel, itemsize, *, granularity, n_batch,
               target_bytes):
    """Largest divisor of C that is a multiple of `granularity` (or == C), fits
    the block byte budget, and (when possible) leaves >= 2 grid points so both
    TensorCores on a megacore chip get work."""
    legal = [t for t in range(1, C + 1)
             if C % t == 0 and (t == C or t % granularity == 0)]
    fitting = [t for t in legal if t * elems_per_channel * itemsize <= target_bytes]
    cands = fitting if fitting else [min(legal)]
    occupied = [t for t in cands if n_batch * (C // t) >= 2]
    return max(occupied) if occupied else max(cands)


def _peg_forward_nchw(x, w, b, *, target_block_bytes):
    N, C, H, W = x.shape
    K = w.shape[-1]
    P = K // 2
    HW = H * W

    # Free reshapes (merge of contiguous minor dims) — no HBM data movement.
    xf = x.reshape(N, C, HW)
    wf = w.reshape(C, K * K)
    bf = b.reshape(C, 1)

    # Sublane packing granularity: 8 for f32, 16 for bf16, 32 for int8/fp8.
    sub = 8 * max(1, 4 // max(1, x.dtype.itemsize))
    TC = _pick_tile(C, HW, x.dtype.itemsize, granularity=sub, n_batch=N,
                    target_bytes=target_block_bytes)

    LPAD = ((P * W + P + 127) // 128) * 128   # 128-aligned lane halo
    assert LPAD >= P * W + P                  # OOB on a VMEM ref is unchecked

    grid = (N, C // TC)
    kernel = functools.partial(_peg_kernel_nchw, H=H, W=W, K=K, LPAD=LPAD)

    flops = 2 * N * C * HW * (K * K + 1)
    bytes_accessed = (2 * xf.size * xf.dtype.itemsize
                      + wf.size * wf.dtype.itemsize
                      + bf.size * bf.dtype.itemsize)

    out = pl.pallas_call(
        kernel,
        out_shape=jax.ShapeDtypeStruct((N, C, HW), x.dtype),
        grid_spec=pltpu.PrefetchScalarGridSpec(
            num_scalar_prefetch=0,
            grid=grid,
            in_specs=[
                pl.BlockSpec((1, TC, HW), lambda n, c: (n, c, 0)),
                pl.BlockSpec((TC, K * K), lambda n, c: (c, 0)),
                pl.BlockSpec((TC, 1), lambda n, c: (c, 0)),
            ],
            out_specs=pl.BlockSpec((1, TC, HW), lambda n, c: (n, c, 0)),
            scratch_shapes=[pltpu.VMEM((TC, HW + 2 * LPAD), jnp.float32)],
        ),
        compiler_params=pltpu.CompilerParams(
            dimension_semantics=("parallel", "parallel"),
        ),
        cost_estimate=pl.CostEstimate(
            flops=flops, transcendentals=0, bytes_accessed=bytes_accessed),
    )(xf, wf, bf)

    return out.reshape(N, C, H, W)


def peg_forward_tokens(tokens, w, b, H, W, *, target_block_bytes=2 << 20):
    """PEG on a channels-last token map: tokens (N, H*W, C), returns (N, H*W, C).

    Preferred entry when the caller already holds (B, N, C) tokens (the natural
    ViT layout) and C is a multiple of 128 — no transposes needed anywhere.
    """
    N, HW, C = tokens.shape
    assert HW == H * W
    K = w.shape[-1]
    P = K // 2

    wf = w.reshape(C, K * K).T                # (K*K, C) — tiny
    bf = b.reshape(1, C)

    TCc = _pick_tile(C, HW, tokens.dtype.itemsize, granularity=128, n_batch=N,
                     target_bytes=target_block_bytes)

    SPAD = ((P * W + P + 7) // 8) * 8         # 8-aligned sublane halo
    assert SPAD >= P * W + P                  # OOB on a VMEM ref is unchecked

    grid = (N, C // TCc)
    kernel = functools.partial(_peg_kernel_cl, H=H, W=W, K=K, SPAD=SPAD)

    flops = 2 * N * C * HW * (K * K + 1)
    bytes_accessed = (2 * tokens.size * tokens.dtype.itemsize
                      + wf.size * wf.dtype.itemsize
                      + bf.size * bf.dtype.itemsize)

    return pl.pallas_call(
        kernel,
        out_shape=jax.ShapeDtypeStruct((N, HW, C), tokens.dtype),
        grid_spec=pltpu.PrefetchScalarGridSpec(
            num_scalar_prefetch=0,
            grid=grid,
            in_specs=[
                pl.BlockSpec((1, HW, TCc), lambda n, c: (n, 0, c)),
                pl.BlockSpec((K * K, TCc), lambda n, c: (0, c)),
                pl.BlockSpec((1, TCc), lambda n, c: (0, c)),
            ],
            out_specs=pl.BlockSpec((1, HW, TCc), lambda n, c: (n, 0, c)),
            scratch_shapes=[pltpu.VMEM((HW + 2 * SPAD, TCc), jnp.float32)],
        ),
        compiler_params=pltpu.CompilerParams(
            dimension_semantics=("parallel", "parallel"),
        ),
        cost_estimate=pl.CostEstimate(
            flops=flops, transcendentals=0, bytes_accessed=bytes_accessed),
    )(tokens, wf, bf)


def peg_forward(x, w, b, *, target_block_bytes=2 << 20):
    """PEG forward on NCHW input: depthwise conv(k, pad=k//2, groups=C) + bias
    + residual (matches nn.Conv2d cross-correlation semantics).

    x: (N, C, H, W); w: (C, 1, K, K) depthwise weights; b: (C,) bias.
    """
    N, C, H, W = x.shape
    K = w.shape[-1]
    assert w.shape == (C, 1, K, K) and b.shape == (C,)
    assert K % 2 == 1, "PEG needs odd kernel_size so padding=k//2 preserves shape"

    if C % 128 == 0:
        # Channels-last kernel path (biggest structural win when C >= 128).
        # TODO(synk): callers that already hold (B, N, C) tokens should call
        # peg_forward_tokens directly and skip these two transposes.
        x_cl = jnp.transpose(x.reshape(N, C, H * W), (0, 2, 1))   # (N, HW, C)
        out = peg_forward_tokens(x_cl, w, b, H, W,
                                 target_block_bytes=target_block_bytes)
        return jnp.transpose(out, (0, 2, 1)).reshape(N, C, H, W)

    return _peg_forward_nchw(x, w, b, target_block_bytes=target_block_bytes)


def peg_ref(x, w, b):
    """Pure-JAX reference: depthwise conv (cross-correlation) + bias + residual."""
    C = x.shape[1]
    y = jax.lax.conv_general_dilated(
        x, w, window_strides=(1, 1), padding="SAME",
        feature_group_count=C,
        dimension_numbers=("NCHW", "OIHW", "NCHW"))
    return y + b[None, :, None, None] + x


if __name__ == "__main__":
    keys = jax.random.split(jax.random.PRNGKey(0), 6)
    K = 3

    # Case 1: small NCHW map, C not a multiple of 128 -> NCHW-native kernel.
    N, C, H, W = 2, 4, 16, 16
    x = jax.random.normal(keys[0], (N, C, H, W), dtype=jnp.float32)
    w = 0.1 * jax.random.normal(keys[1], (C, 1, K, K), dtype=jnp.float32)
    b = 0.1 * jax.random.normal(keys[2], (C,), dtype=jnp.float32)

    out = jax.block_until_ready(peg_forward(x, w, b))
    ref = peg_ref(x, w, b)
    assert out.shape == (N, C, H, W)
    err1 = float(jnp.max(jnp.abs(out - ref)))
    assert jnp.allclose(out, ref, atol=1e-4, rtol=1e-4), err1

    # Case 2: C a multiple of 128 -> channels-last (token-layout) kernel path.
    N2, C2, H2, W2 = 2, 128, 8, 8
    x2 = jax.random.normal(keys[3], (N2, C2, H2, W2), dtype=jnp.float32)
    w2 = 0.1 * jax.random.normal(keys[4], (C2, 1, K, K), dtype=jnp.float32)
    b2 = 0.1 * jax.random.normal(keys[5], (C2,), dtype=jnp.float32)

    out2 = jax.block_until_ready(peg_forward(x2, w2, b2))
    ref2 = peg_ref(x2, w2, b2)
    assert out2.shape == (N2, C2, H2, W2)
    err2 = float(jnp.max(jnp.abs(out2 - ref2)))
    assert jnp.allclose(out2, ref2, atol=1e-4, rtol=1e-4), err2

    print("KERNEL_OK")
</pallas_src>

<mosaic_0001>
module attributes {stable_mosaic.version = 11 : i64} {
  func.func @_peg_kernel_nchw(%arg0: i32, %arg1: i32, %arg2: memref<1x4x256xf32, #tpu.memory_space<vmem>>, %arg3: memref<4x9xf32, #tpu.memory_space<vmem>>, %arg4: memref<4x1xf32, #tpu.memory_space<vmem>>, %arg5: memref<1x4x256xf32, #tpu.memory_space<vmem>>, %arg6: memref<4x512xf32, #tpu.memory_space<vmem>>) attributes {dimension_semantics = [#tpu.dimension_semantics<parallel>, #tpu.dimension_semantics<parallel>], iteration_bounds = array<i64: 2, 1>, scalar_prefetch = 0 : i64, scratch_operands = 1 : i64, tpu.core_type = #tpu.core_type<tc>, window_params = [{transform_indices = @transform_0, window_bounds = array<i64: 1, 4, 256>}, {transform_indices = @transform_1, window_bounds = array<i64: 4, 9>}, {transform_indices = @transform_2, window_bounds = array<i64: 4, 1>}, {transform_indices = @transform_3, window_bounds = array<i64: 1, 4, 256>}]} {
    %c0 = arith.constant 0 : index
    %c0_0 = arith.constant 0 : index
    %c0_1 = arith.constant 0 : index
    %0 = vector.load %arg2[%c0, %c0_0, %c0_1] : memref<1x4x256xf32, #tpu.memory_space<vmem>>, vector<1x4x256xf32>
    %1 = vector.shape_cast %0 : vector<1x4x256xf32> to vector<4x256xf32>
    %c0_2 = arith.constant 0 : index
    %c0_3 = arith.constant 0 : index
    %2 = vector.load %arg4[%c0_2, %c0_3] : memref<4x1xf32, #tpu.memory_space<vmem>>, vector<4x1xf32>
    %cst = arith.constant 0.000000e+00 : f32
    %3 = vector.broadcast %cst : f32 to vector<4x128xf32>
    %c0_4 = arith.constant 0 : index
    %c0_5 = arith.constant 0 : index
    %4 = vector.load %arg6[%c0_4, %c0_5] : memref<4x512xf32, #tpu.memory_space<vmem>>, vector<4x128xf32>
    tpu.vector_store %arg6[%c0_4, %c0_5], %3 {strides = array<i32>} : memref<4x512xf32, #tpu.memory_space<vmem>>, vector<4x128xf32>,
    %cst_6 = arith.constant 0.000000e+00 : f32
    %5 = vector.broadcast %cst_6 : f32 to vector<4x128xf32>
    %c0_7 = arith.constant 0 : index
    %c384 = arith.constant 384 : index
    %6 = vector.load %arg6[%c0_7, %c384] : memref<4x512xf32, #tpu.memory_space<vmem>>, vector<4x128xf32>
    tpu.vector_store %arg6[%c0_7, %c384], %5 {strides = array<i32>} : memref<4x512xf32, #tpu.memory_space<vmem>>, vector<4x128xf32>,
    %c0_8 = arith.constant 0 : index
    %c128 = arith.constant 128 : index
    %7 = vector.load %arg6[%c0_8, %c128] : memref<4x512xf32, #tpu.memory_space<vmem>>, vector<4x256xf32>
    tpu.vector_store %arg6[%c0_8, %c128], %1 {strides = array<i32>} : memref<4x512xf32, #tpu.memory_space<vmem>>, vector<4x256xf32>,
    %8 = tpu.iota {dimensions = array<i32: 1>} : vector<1x256xi32>
    %c16_i32 = arith.constant 16 : i32
    %c0_i32 = arith.constant 0 : i32
    %9 = arith.cmpi eq, %c16_i32, %c0_i32 : i32
    %c1_i32 = arith.constant 1 : i32
    %10 = arith.select %9, %c1_i32, %c16_i32 : i32
    %11 = vector.broadcast %10 : i32 to vector<1x256xi32>
    %12 = arith.remsi %8, %11 : vector<1x256xi32>
    %c0_i32_9 = arith.constant 0 : i32
    %13 = vector.broadcast %c0_i32_9 : i32 to vector<1x256xi32>
    %14 = arith.cmpi ne, %12, %13 : vector<1x256xi32>
    %c0_i32_10 = arith.constant 0 : i32
    %15 = vector.broadcast %c0_i32_10 : i32 to vector<1x256xi32>
    %16 = arith.cmpi slt, %12, %15 : vector<1x256xi32>
    %c0_i32_11 = arith.constant 0 : i32
    %17 = arith.cmpi slt, %10, %c0_i32_11 : i32
    %18 = vector.broadcast %17 : i1 to vector<1x256xi1>
    %19 = vector.broadcast %18 : vector<1x256xi1> to vector<1x256xi1>
    %20 = arith.xori %16, %19 : vector<1x256xi1>
    %21 = arith.andi %20, %14 : vector<1x256xi1>
    %22 = vector.broadcast %10 : i32 to vector<1x256xi32>
    %23 = arith.addi %12, %22 : vector<1x256xi32>
    %24 = arith.select %21, %23, %12 : vector<1x256xi1>, vector<1x256xi32>
    %25 = vector.broadcast %2 : vector<4x1xf32> to vector<4x256xf32>
    %26 = arith.addf %1, %25 : vector<4x256xf32>
    %c0_12 = arith.constant 0 : index
    %c111 = arith.constant 111 : index
    %27 = vector.load %arg6[%c0_12, %c111] : memref<4x512xf32, #tpu.memory_space<vmem>>, vector<4x256xf32>
    %c0_13 = arith.constant 0 : index
    %c0_14 = arith.constant 0 : index
    %28 = vector.load %arg3[%c0_13, %c0_14] : memref<4x9xf32, #tpu.memory_space<vmem>>, vector<4x1xf32>
    %29 = vector.broadcast %28 : vector<4x1xf32> to vector<4x256xf32>
    %30 = arith.mulf %27, %29 : vector<4x256xf32>
    %c0_15 = arith.constant 0 : index
    %c127 = arith.constant 127 : index
    %31 = vector.load %arg6[%c0_15, %c127] : memref<4x512xf32, #tpu.memory_space<vmem>>, vector<4x256xf32>
    %c0_16 = arith.constant 0 : index
    %c3 = arith.constant 3 : index
    %32 = vector.load %arg3[%c0_16, %c3] : memref<4x9xf32, #tpu.memory_space<vmem>>, vector<4x1xf32>
    %33 = vector.broadcast %32 : vector<4x1xf32> to vector<4x256xf32>
    %34 = arith.mulf %31, %33 : vector<4x256xf32>
    %35 = arith.addf %30, %34 : vector<4x256xf32>
    %c0_17 = arith.constant 0 : index
    %c143 = arith.constant 143 : index
    %36 = vector.load %arg6[%c0_17, %c143] : memref<4x512xf32, #tpu.memory_space<vmem>>, vector<4x256xf32>
    %c0_18 = arith.constant 0 : index
    %c6 = arith.constant 6 : index
    %37 = vector.load %arg3[%c0_18, %c6] : memref<4x9xf32, #tpu.memory_space<vmem>>, vector<4x1xf32>
    %38 = vector.broadcast %37 : vector<4x1xf32> to vector<4x256xf32>
    %39 = arith.mulf %36, %38 : vector<4x256xf32>
    %40 = arith.addf %35, %39 : vector<4x256xf32>
    %c-1_i32 = arith.constant -1 : i32
    %41 = vector.broadcast %c-1_i32 : i32 to vector<1x256xi32>
    %42 = arith.addi %24, %41 : vector<1x256xi32>
    %c0_i32_19 = arith.constant 0 : i32
    %43 = vector.broadcast %c0_i32_19 : i32 to vector<1x256xi32>
    %44 = arith.cmpi sge, %42, %43 : vector<1x256xi32>
    %c-1_i32_20 = arith.constant -1 : i32
    %45 = vector.broadcast %c-1_i32_20 : i32 to vector<1x256xi32>
    %46 = arith.addi %24, %45 : vector<1x256xi32>
    %c16_i32_21 = arith.constant 16 : i32
    %47 = vector.broadcast %c16_i32_21 : i32 to vector<1x256xi32>
    %48 = arith.cmpi slt, %46, %47 : vector<1x256xi32>
    %49 = arith.andi %44, %48 : vector<1x256xi1>
    %cst_22 = arith.constant 0.000000e+00 : f32
    %50 = vector.shape_cast %49 : vector<1x256xi1> to vector<1x256xi1>
    %51 = vector.broadcast %50 : vector<1x256xi1> to vector<4x256xi1>
    %52 = vector.broadcast %cst_22 : f32 to vector<4x256xf32>
    %53 = arith.select %51, %40, %52 : vector<4x256xi1>, vector<4x256xf32>
    %54 = arith.addf %26, %53 : vector<4x256xf32>
    %c0_23 = arith.constant 0 : index
    %c112 = arith.constant 112 : index
    %55 = vector.load %arg6[%c0_23, %c112] : memref<4x512xf32, #tpu.memory_space<vmem>>, vector<4x256xf32>
    %c0_24 = arith.constant 0 : index
    %c1 = arith.constant 1 : index
    %56 = vector.load %arg3[%c0_24, %c1] : memref<4x9xf32, #tpu.memory_space<vmem>>, vector<4x1xf32>
    %57 = vector.broadcast %56 : vector<4x1xf32> to vector<4x256xf32>
    %58 = arith.mulf %55, %57 : vector<4x256xf32>
    %c0_25 = arith.constant 0 : index
    %c128_26 = arith.constant 128 : index
    %59 = vector.load %arg6[%c0_25, %c128_26] : memref<4x512xf32, #tpu.memory_space<vmem>>, vector<4x256xf32>
    %c0_27 = arith.constant 0 : index
    %c4 = arith.constant 4 : index
    %60 = vector.load %arg3[%c0_27, %c4] : memref<4x9xf32, #tpu.memory_space<vmem>>, vector<4x1xf32>
    %61 = vector.broadcast %60 : vector<4x1xf32> to vector<4x256xf32>
    %62 = arith.mulf %59, %61 : vector<4x256xf32>
    %63 = arith.addf %58, %62 : vector<4x256xf32>
    %c0_28 = arith.constant 0 : index
    %c144 = arith.constant 144 : index
    %64 = vector.load %arg6[%c0_28, %c144] : memref<4x512xf32, #tpu.memory_space<vmem>>, vector<4x256xf32>
    %c0_29 = arith.constant 0 : index
    %c7 = arith.constant 7 : index
    %65 = vector.load %arg3[%c0_29, %c7] : memref<4x9xf32, #tpu.memory_space<vmem>>, vector<4x1xf32>
    %66 = vector.broadcast %65 : vector<4x1xf32> to vector<4x256xf32>
    %67 = arith.mulf %64, %66 : vector<4x256xf32>
    %68 = arith.addf %63, %67 : vector<4x256xf32>
    %69 = arith.addf %54, %68 : vector<4x256xf32>
    %c0_30 = arith.constant 0 : index
    %c113 = arith.constant 113 : index
    %70 = vector.load %arg6[%c0_30, %c113] : memref<4x512xf32, #tpu.memory_space<vmem>>, vector<4x256xf32>
    %c0_31 = arith.constant 0 : index
    %c2 = arith.constant 2 : index
    %71 = vector.load %arg3[%c0_31, %c2] : memref<4x9xf32, #tpu.memory_space<vmem>>, vector<4x1xf32>
    %72 = vector.broadcast %71 : vector<4x1xf32> to vector<4x256xf32>
    %73 = arith.mulf %70, %72 : vector<4x256xf32>
    %c0_32 = arith.constant 0 : index
    %c129 = arith.constant 129 : index
    %74 = vector.load %arg6[%c0_32, %c129] : memref<4x512xf32, #tpu.memory_space<vmem>>, vector<4x256xf32>
    %c0_33 = arith.constant 0 : index
    %c5 = arith.constant 5 : index
    %75 = vector.load %arg3[%c0_33, %c5] : memref<4x9xf32, #tpu.memory_space<vmem>>, vector<4x1xf32>
    %76 = vector.broadcast %75 : vector<4x1xf32> to vector<4x256xf32>
    %77 = arith.mulf %74, %76 : vector<4x256xf32>
    %78 = arith.addf %73, %77 : vector<4x256xf32>
    %c0_34 = arith.constant 0 : index
    %c145 = arith.constant 145 : index
    %79 = vector.load %arg6[%c0_34, %c145] : memref<4x512xf32, #tpu.memory_space<vmem>>, vector<4x256xf32>
    %c0_35 = arith.constant 0 : index
    %c8 = arith.constant 8 : index
    %80 = vector.load %arg3[%c0_35, %c8] : memref<4x9xf32, #tpu.memory_space<vmem>>, vector<4x1xf32>
    %81 = vector.broadcast %80 : vector<4x1xf32> to vector<4x256xf32>
    %82 = arith.mulf %79, %81 : vector<4x256xf32>
    %83 = arith.addf %78, %82 : vector<4x256xf32>
    %c1_i32_36 = arith.constant 1 : i32
    %84 = vector.broadcast %c1_i32_36 : i32 to vector<1x256xi32>
    %85 = arith.addi %24, %84 : vector<1x256xi32>
    %c0_i32_37 = arith.constant 0 : i32
    %86 = vector.broadcast %c0_i32_37 : i32 to vector<1x256xi32>
    %87 = arith.cmpi sge, %85, %86 : vector<1x256xi32>
    %c1_i32_38 = arith.constant 1 : i32
    %88 = vector.broadcast %c1_i32_38 : i32 to vector<1x256xi32>
    %89 = arith.addi %24, %88 : vector<1x256xi32>
    %c16_i32_39 = arith.constant 16 : i32
    %90 = vector.broadcast %c16_i32_39 : i32 to vector<1x256xi32>
    %91 = arith.cmpi slt, %89, %90 : vector<1x256xi32>
    %92 = arith.andi %87, %91 : vector<1x256xi1>
    %cst_40 = arith.constant 0.000000e+00 : f32
    %93 = vector.shape_cast %92 : vector<1x256xi1> to vector<1x256xi1>
    %94 = vector.broadcast %93 : vector<1x256xi1> to vector<4x256xi1>
    %95 = vector.broadcast %cst_40 : f32 to vector<4x256xf32>
    %96 = arith.select %94, %83, %95 : vector<4x256xi1>, vector<4x256xf32>
    %97 = arith.addf %69, %96 : vector<4x256xf32>
    %c0_41 = arith.constant 0 : index
    %c0_42 = arith.constant 0 : index
    %c0_43 = arith.constant 0 : index
    %98 = vector.load %arg5[%c0_41, %c0_42, %c0_43] : memref<1x4x256xf32, #tpu.memory_space<vmem>>, vector<1x4x256xf32>
    %99 = vector.shape_cast %98 : vector<1x4x256xf32> to vector<4x256xf32>
    %100 = vector.shape_cast %97 : vector<4x256xf32> to vector<1x4x256xf32>
    tpu.vector_store %arg5[%c0_41, %c0_42, %c0_43], %100 {strides = array<i32>} : memref<1x4x256xf32, #tpu.memory_space<vmem>>, vector<1x4x256xf32>,
    return
  }
  func.func @transform_0(%arg0: i32, %arg1: i32) -> (i32, i32, i32) {
    %c0_i32 = arith.constant 0 : i32
    %c0_i32_0 = arith.constant 0 : i32
    return %arg0, %arg1, %c0_i32 : i32, i32, i32
  }
  func.func @transform_1(%arg0: i32, %arg1: i32) -> (i32, i32) {
    %c0_i32 = arith.constant 0 : i32
    %c0_i32_0 = arith.constant 0 : i32
    return %arg1, %c0_i32 : i32, i32
  }
  func.func @transform_2(%arg0: i32, %arg1: i32) -> (i32, i32) {
    %c0_i32 = arith.constant 0 : i32
    %c0_i32_0 = arith.constant 0 : i32
    return %arg1, %c0_i32 : i32, i32
  }
  func.func @transform_3(%arg0: i32, %arg1: i32) -> (i32, i32, i32) {
    %c0_i32 = arith.constant 0 : i32
    %c0_i32_0 = arith.constant 0 : i32
    return %arg0, %arg1, %c0_i32 : i32, i32, i32
  }
}

</mosaic_0001>

<bundles_post_ra>
// kernel: tpu_custom_call.1
= control target key start
LH: loop header
LB: loop body
LE: loop exit
PB: predicated region body
PF: predicated region fallthrough
CT: control target
= control target key end

     0   :  { %8 = vsyncpa [#allocation4], 0  ;;  %s1195_s0 = inlined_call_operand.hbm [shape: f32[2,4,256], index: 0, kind: input, shape index: {}]   ;;  %s1196_s1 = inlined_call_operand.vmem [shape: f32[4,9], index: 1, kind: input, shape index: {}]   ;;  %s1197_s2 = inlined_call_operand.vmem [shape: f32[4,1], index: 2, kind: input, shape index: {}]   ;;  %s1198_s3 = inlined_call_operand.hbm [shape: f32[2,4,256], index: 3, kind: output, shape index: {}]  }
   0x1   :  { %10 = vsyncpa [#allocation4 + $0x1], 0 }
   0x2   :  { %11 = vsyncpa [#allocation5], 0 }
   0x3   :  { %13 = vsyncpa [#allocation5 + $0x1], 0  ;;  %s962_s12 = smov 0   ;;  %s964_s13 = smov 0  }
   0x4   :  { %s966_s14 = smov 0   ;;  %s968_s15 = smov 0  }
   0x5   :  { %s970_s16 = smov 0   ;;  %s972_s17 = smov 0  }
   0x6 LB: > { %s702_s18 = sadd.s32 4294967295, %s922_s17   ;;  %s703_s19 = sadd.s32 4294967294, %s922_s17   ;;  %s922_s17 = sphi %s972_s17, %s19_s17   ;;  %s918_s16 = sphi %s970_s16, %s1214_s16   ;;  %s914_s15 = sphi %s968_s15, %s1213_s15   ;;  %s910_s14 = sphi %s966_s14, %s1212_s14   ;;  %s906_s13 = sphi %s964_s13, %s1211_s13   ;;  %s902_s12 = sphi %s962_s12, %s1210_s12  }
   0x7   : > { %s31_s20 = sadd.s32 1, %s918_s16  ;;  %s40_s21 = sadd.s32 1, %s910_s14 }
   0x8   : > { %p33_p0 = scmp.ge.s32.totalorder %s31_s20, 2  ;;  %p47_p1 = scmp.ne.s32.totalorder %s910_s14, %s906_s13 }
   0x9   : > { %p48_p2 = scmp.eq.s32.totalorder %s922_s17, 0  ;;  %p53_p3 = scmp.ne.s32.totalorder %s906_s13, %s902_s12 }
   0xa   : > { %s1216_s20 = smov (%p33_p0, %s31_s20), 0  ;;  %p54_p5 = scmp.eq.s32.totalorder %s702_s18, 0 }
   0xb   : > { %p1003_p4 = por %p48_p2, %p47_p1  ;;  %s35_s23 = ssub.s32 %s918_s16, %s1216_s20 }
   0xc   : > { %p131_p6 = scmp.eq.s32.totalorder %s702_s18, 1  ;;  %p38_p7 = scmp.eq.s32.totalorder %s35_s23, 0 }
   0xd   : > { %p1009_p8 = por %p54_p5, %p53_p3  ;;  %p137_p10 = scmp.eq.s32.totalorder %s703_s19, 1 }
   0xe   : > { %p1013_p9 = por %p131_p6, %p47_p1  ;;  %p733_p13 = scmp.lt.s32.totalorder %s922_s17, 2 }
   0xf   : > { %s1018_s26 = scalar_select %p38_p7, %s910_s14, %s40_s21  }
  0x10   : > { %s1202_s25 = scalar_select %p1013_p9, 1, 0 }
  0x11   : > { %p1020_p11 = por %p137_p10, %p53_p3  ;;  %s171_s28 = sand.u32 1, %s910_s14  }
  0x12   : > { %s708_s29 = sshll.u32 %s171_s28, 3  ;;  %s719_s30 = sshll.u32 %s918_s16, 7 }
  0x13   : > { %s1203_s27 = scalar_select %p1020_p11, 1, 0 }
  0x14   : > { %s1031_s6 = scalar_lea.hbm %s1195_s0, %s719_s30  ;;  %s175_s7 = scalar_lea.vmem [#allocation3], %s708_s29 }
  0x15   : > { %s185_s8 = sshll.u32 %s175_s7, 4  ;;  %p1037_p0 = pnand %p733_p13, %p1003_p4  ;;  %s1033_s8 = int_to_ptr.vmem [resolvable:$true] %s185_s8 }
  0x16   : > { %s172_s10 = scalar_lea.sflag [#allocation4], %s171_s28  ;;  %s810_s11 = scalar_lea.hbm %s1031_s6, 128 }
  0x17   : > { %p811_p3 = scmp.ne.s32.totalorder %s1031_s6, %s810_s11  ;;  %p812_p5 = pneg %p1037_p0 }
  0x18   : > { %s815_s21 = scalar_lea.hbm %s1195_s0, 256  ;;  %p816_p4 = scmp.lt.u32.totalorder %s1031_s6, %s1195_s0 }
  0x19   : > { %p813_p6 = pnand %p812_p5, %p811_p3  ;;  %p817_p10 = scmp.lt.u32.totalorder %s815_s21, %s810_s11 }
  0x1a   : > { %p819_p12 = scmp.lt.u32.totalorder %s810_s11, %s1031_s6 }
  0x1b   : > { %p814_p7 = pneg %p813_p6  ;;  %p818_p13 = por %p817_p10, %p816_p4 }
  0x1d   : > { %p820_p1 = por %p819_p12, %p818_p13 }
  0x1f   : > { %p821_p2 = pnand %p820_p1, %p814_p7 }
  0x21   : > { %824 = shalt.err (!%p821_p2)
}
  0x22   : > { %s825_s28 = scalar_lea.vmem %s1033_s8, 128  ;;  %s924_s29 = smov [#allocation3]  }
  0x23   : > { %p826_p3 = scmp.ne.s32.totalorder %s1033_s8, %s825_s28  ;;  %s830_s30 = sshll.u32 %s924_s29, 4  ;;  %s831_s30 = int_to_ptr.vmem [resolvable:$false] %s830_s30 }
  0x24   : > { %s832_s4 = scalar_lea.vmem %s831_s30, 256  ;;  %p833_p9 = scmp.lt.s32.totalorder %s1033_s8, %s831_s30 }
  0x25   : > { %p828_p6 = pnand %p826_p3, %p812_p5  ;;  %p834_p4 = scmp.lt.s32.totalorder %s832_s4, %s825_s28 }
  0x27   : > { %p829_p11 = pneg %p828_p6  ;;  %p835_p10 = por %p834_p4, %p833_p9 }
  0x29   : > { %p836_p12 = pnand %p835_p10, %p829_p11 }
  0x2b   : > { %839 = shalt.err (!%p836_p12)
}
  0x2c   : > { %728 = dma.hbm_to_vmem [thread:$0]  (!%p1037_p0), %s1031_s6, 128, %s1033_s8, %s172_s10  }
  0x2d   : > { %p1205_p1 = scmp.lt.s32.totalorder %s922_s17, 3  ;;  %p1206_p2 = scmp.ge.s32.totalorder %s922_s17, 1 }
  0x2f   : > { %p191_p5 = pnand %p1206_p2, %p1205_p1 }
  0x30   : > { %s1073_s5 = sand.u32 (!%p191_p5), 1, %s906_s13  }
  0x31   : > { %194 = sbr.rel (%p191_p5) target bundleno = 471 (0x1d7), region = 32  ;;  %s712_s7 = sshll.u32 (!%p191_p5), %s1073_s5, 3 }
  0x32   : > { %s197_s11 = scalar_lea.sflag (!%p191_p5), [#allocation4], %s1073_s5  ;;  %s200_s9 = scalar_lea.vmem (!%p191_p5), [#allocation3], %s712_s7 }
  0x38   : > { %893 = dma.done.wait (%p1009_p8), %s197_s11, 128  }
  0x39   : > { %895 = vsyncadd (%p1009_p8), %s197_s11, 4294967168  ;;  %v925_v0 = vmov 3   ;;  %v926_v1 = vmov 4   ;;  %v927_v2 = vmov 0.0   ;;  %v286_v3 = vld [vmem:[%s1196_s1] sm:$0xf]  ;;  %v244_v13 = vlaneseq }
  0x3a   : > { %799 = vset.pattern.permute.xlu0 %v925_v0  ;;  %801 = vset.pattern.permute.xlu1 %v926_v1  ;;  %241 = vst [vmem:[#allocation2] sm:$0xf] %v927_v2  ;;  %242 = vst [vmem:[#allocation2 + $0xc] sm:$0xf] %v927_v2  ;;  %v394_v4 = vld [vmem:[%s1196_s1] sm:$0xf] }
  0x3b   : > { %v1089_v5 = vld [vmem:[%s200_s9] sm:$0xff]  ;;  %302 = vperm.xlu0 %799, %v286_v3   ;;  %411 = vperm.xlu1 %801, %v394_v4   ;;  %v928_v6 = vmov 6   ;;  %v929_v7 = vmov 5   ;;  %v930_v8 = vmov 7   ;;  %v931_v9 = vmov 8   ;;  %s936_s24 = smov 112  }
  0x3c   : > { %243 = vst [vmem:[#allocation2 + $0x4] sm:$0xff] %v1089_v5  ;;  %v932_v10 = vmov 0   ;;  %v933_v11 = vmov 2   ;;  %v934_v12 = vmov 1   ;;  %v935_v14 = vmov 839922192  }
  0x3d   : > { %v276_v15 = vunpack.c.l.s4 %v935_v14  ;;  %v279_v17 = vshrl.u32 %v244_v13, 7  ;;  %s937_s19 = smov 96   ;;  %v240_v46 = vld [vmem:[%s1197_s2] sm:$0xf]  ;;  %vm322_vm0 = vcmask 1043456   ;;  %vm324_vm1 = vcmask 916480  }
  0x3e   : > { %vm352_vm2 = vcmask 785408   ;;  %s938_s23 = smov 17   ;;  %s939_s28 = smov 16   ;;  %vm380_vm3 = vcmask 138240   ;;  %vm558_vm6 = vcmask 121856   ;;  %vm468_vm7 = vcmask 130048  }
  0x3f   : > { %800 = vset.pattern.permute.xlu0 %v928_v6  ;;  %802 = vset.pattern.permute.xlu1 %v929_v7  ;;  %v277_v16 = vunpack.c.0.s8 %v276_v15  ;;  %s940_s29 = smov 15   ;;  %s720_s30 = sshll.u32 %s914_s15, 7 }
  0x40   : > { %333 = vperm.xlu0 %800, %v286_v3   ;;  %486 = vperm.xlu1 %802, %v394_v4   ;;  %s230_s4 = scalar_lea.vmem [#allocation6], %s712_s7  ;;  %s1146_s8 = scalar_lea.hbm %s1198_s3, %s720_s30 }
  0x41   : > { %v1093_v18 = vsub.s32 %v277_v16, %v279_v17  ;;  %v331_v37 = vld [vmem:[#allocation2 + $0xc] sm:$0xf]  ;;  %s588_s11 = sshll.u32 %s230_s4, 4  ;;  %s572_s10 = scalar_lea.sflag [#allocation5], %s1073_s5  ;;  %s1148_s11 = int_to_ptr.vmem [resolvable:$true] %s588_s11 }
  0x42   : > { %v432_v42 = vld [vmem:[#allocation2 + $0xc] sm:$0xf]  ;;  %s840_s18 = scalar_lea.vmem %s1148_s11, 128  ;;  %p1207_p9 = scmp.ne.s32.totalorder %s1202_s25, 0 }
  0x43   : > { %v1095_v20 = vld [vmem:[#allocation2] sm:$0xff]  ;;  %v285_v24 = vld [vmem:[#allocation2 + $0x8] sm:$0xf]  ;;  %p841_p8 = scmp.ne.s32.totalorder %s1148_s11, %s840_s18  ;;  %s941_s15 = smov [#allocation6]  }
  0x44   : > { %803 = vset.pattern.permute.xlu1 %v930_v8  ;;  %804 = vset.pattern.permute.xlu0 %v931_v9  ;;  %v393_v0 = vld [vmem:[#allocation2 + $0x8] sm:$0xf]  ;;  %s844_s7 = sshll.u32 %s941_s15, 4  ;;  %s845_s7 = int_to_ptr.vmem [resolvable:$false] %s844_s7 }
  0x45   : > { %434 = vperm.xlu1 %803, %v394_v4   ;;  %512 = vperm.xlu0 %804, %v394_v4   ;;  %p842_p11 = pnand %p841_p8, %p1207_p9  ;;  %p847_p7 = scmp.lt.s32.totalorder %s1148_s11, %s845_s7 }
  0x47   : > { %p843_p0 = pneg %p842_p11 }
  0x49   : > { %805 = vset.pattern.permute.xlu1 %v932_v10  ;;  %807 = vset.pattern.permute.xlu0 %v933_v11 }
  0x4a   : > { %289 = vperm.xlu1 %805, %v286_v3   ;;  %473 = vperm.xlu0 %807, %v394_v4  }
  0x4e   : > { %806 = vset.pattern.permute.xlu1 %v934_v12  ;;  %809 = vset.pattern.permute.xlu0 %v931_v9 }
  0x4f   : > { %397 = vperm.xlu1 %806, %v394_v4  }
  0x53   : > { %808 = vset.pattern.permute.xlu1 %v932_v10 }
  0xba   : > { %v303_v19 = vpop.permute.xlu0 %302  ;;  %v412_v21 = vpop.permute.xlu1 %411 }
  0xbb   : > { %v310_v22 = vrot.slane %v303_v19, %v1093_v18  ;;  %v419_v30 = vrot.slane %v412_v21, %v1093_v18 }
  0xbd   : > { %v312_v23 = vmul.f32 %v310_v22, %v1095_v20  ;;  %v313_v29 = vmul.f32 %v310_v22, %v285_v24  ;;  %v421_v35 = vmul.f32 %v419_v30, %v1089_v5 }
  0xbf   : > { %v334_v25 = vpop.permute.xlu0 %333  ;;  %316 = vrot.lane.b32.xlu1 %v312_v23, %s936_s24  ;;  %v487_v26 = vpop.permute.xlu1 %486 }
  0xc0   : > { %v341_v27 = vrot.slane %v334_v25, %v1093_v18  ;;  %v494_v28 = vrot.slane %v487_v26, %v1093_v18 }
  0xc2   : > { %v343_v31 = vmul.f32 %v341_v27, %v1089_v5  ;;  %v496_v32 = vmul.f32 %v494_v28, %v1089_v5  ;;  %v344_v40 = vmul.f32 %v341_v27, %v331_v37  ;;  %v497_v44 = vmul.f32 %v494_v28, %v432_v42 }
  0xc3   : > { %318 = vrot.lane.b32.xlu1 %v313_v29, %s936_s24 }
  0xc4   : > { %347 = vrot.lane.b32.xlu0 %v343_v31, %s937_s19  ;;  %v435_v33 = vpop.permute.xlu1 %434  ;;  %v513_v34 = vpop.permute.xlu0 %512 }
  0xc5   : > { %v442_v36 = vrot.slane %v435_v33, %v1093_v18  ;;  %v520_v38 = vrot.slane %v513_v34, %v1093_v18 }
  0xc7   : > { %423 = vrot.lane.b32.xlu1 %v421_v35, %s936_s24  ;;  %v444_v39 = vmul.f32 %v442_v36, %v1089_v5  ;;  %v522_v41 = vmul.f32 %v520_v38, %v1089_v5  ;;  %v445_v43 = vmul.f32 %v442_v36, %v432_v42  ;;  %v523_v45 = vmul.f32 %v520_v38, %v432_v42 }
  0xc8   : > { %500 = vrot.lane.b32.xlu0 %v496_v32, %s936_s24  ;;  %v245_v42 = vand.u32 127, %v244_v13 }
  0xc9   : > { %v290_v47 = vpop.permute.xlu1 %289  ;;  %v474_v49 = vpop.permute.xlu0 %473 }
  0xca   : > { %v297_v53 = vrot.slane %v290_v47, %v1093_v18  ;;  %v481_v1 = vrot.slane %v474_v49, %v1093_v18 }
  0xcb   : > { %349 = vrot.lane.b32.xlu1 %v344_v40, %s937_s19 }
  0xcc   : > { %448 = vrot.lane.b32.xlu0 %v444_v39, %s937_s19  ;;  %v300_v60 = vmul.f32 %v297_v53, %v285_v24  ;;  %v299_v12 = vmul.f32 %v297_v53, %v1095_v20  ;;  %v483_v17 = vmul.f32 %v481_v1, %v1095_v20  ;;  %v484_v35 = vmul.f32 %v481_v1, %v393_v0 }
  0xce   : > { %v398_v48 = vpop.permute.xlu1 %397 }
  0xcf   : > { %526 = vrot.lane.b32.xlu1 %v522_v41, %s937_s19  ;;  %v405_v56 = vrot.slane %v398_v48, %v1093_v18 }
  0xd0   : > { %450 = vrot.lane.b32.xlu0 %v445_v43, %s937_s19 }
  0xd1   : > { %v407_v6 = vmul.f32 %v405_v56, %v1095_v20  ;;  %v408_v14 = vmul.f32 %v405_v56, %v393_v0 }
  0xd3   : > { %502 = vrot.lane.b32.xlu1 %v497_v44, %s936_s24  ;;  %v246_v44 = vadd.s32 128, %v245_v42  ;;  %s846_s24 = scalar_lea.vmem %s845_s7, 256 }
  0xd4   : > { %528 = vrot.lane.b32.xlu0 %v523_v45, %s937_s19  ;;  %p848_p13 = scmp.lt.s32.totalorder %s846_s24, %s840_s18 }
  0xd5   : > { %v258_v47 = vand.u32 15, %v246_v44 }
  0xd6   : > { %p849_p3 = por %p848_p13, %p847_p7 }
  0xd7   : > { %273 = vperm.xlu1 %808, %v240_v46   ;;  %v251_v46 = vand.u32 15, %v245_v42 }
  0xd8   : > { %p850_p6 = pnand %p849_p3, %p843_p0 }
 0x131   : > { %v317_v50 = vpop.permute.xlu1 %316 }
 0x132   : > { %v320_v57 = vrot.slane %v317_v50, 4 }
 0x135   : > { %v319_v51 = vpop.permute.xlu1 %318 }
 0x136   : > { %v348_v52 = vpop.permute.xlu0 %347  ;;  %v321_v54 = vrot.slane %v319_v51, 4  ;;  %v329_v2 = vadd.f32 %v319_v51, %v300_v60  ;;  %v360_v51 = vadd.s32 4294967295, %v258_v47 }
 0x137   : > { %v351_v62 = vrot.slane %v348_v52, 4 }
 0x138   : > { %v323_v61 = vsel %vm322_vm0, %v320_v57, %v321_v54  ;;  %v537_v54 = vadd.s32 1, %v251_v46  ;;  %vm362_vm5 = vcmp.ge.s32.totalorder %v360_v51, 0 }
 0x139   : > { %v424_v55 = vpop.permute.xlu1 %423  ;;  %v325_v9 = vsel %vm324_vm1, %v317_v50, %v323_v61  ;;  %v353_v20 = vsel %vm352_vm2, %v351_v62, %v348_v52  ;;  %v359_v50 = vadd.s32 4294967295, %v251_v46 }
 0x13a   : > { %v425_v58 = vrot.slane %v424_v55, 4  ;;  %v501_v59 = vpop.permute.xlu0 %500  ;;  %v328_v22 = vadd.f32 %v325_v9, %v299_v12  ;;  %vm541_vm8 = vcmp.lt.s32.totalorder %v537_v54, 16 }
 0x13b   : > { %v504_v63 = vrot.slane %v501_v59, 4  ;;  %vm361_vm4 = vcmp.ge.s32.totalorder %v359_v50, 0 }
 0x13c   : > { %v426_v3 = vsel %vm324_vm1, %v425_v58, %v424_v55  ;;  %v430_v23 = vadd.f32 %v425_v58, %v408_v14  ;;  %v357_v33 = vadd.f32 %v353_v20, %v328_v22  ;;  %v538_v55 = vadd.s32 1, %v258_v47 }
 0x13d   : > { %v350_v4 = vpop.permute.xlu1 %349  ;;  %v429_v15 = vadd.f32 %v426_v3, %v407_v6  ;;  %v505_v16 = vsel %vm324_vm1, %v504_v63, %v501_v59 }
 0x13e   : > { %v354_v7 = vsel %vm352_vm2, %v351_v62, %v350_v4  ;;  %v449_v8 = vpop.permute.xlu0 %448  ;;  %v509_v27 = vadd.f32 %v505_v16, %v483_v17  ;;  %v373_v38 = vcombine.high %v357_v33, %v357_v33  ;;  %vm542_vm9 = vcmp.lt.s32.totalorder %v538_v55, 16 }
 0x13f   : > { %v358_v10 = vadd.f32 %v354_v7, %v329_v2  ;;  %v452_v11 = vrot.slane %v449_v8, 4 }
 0x141   : > { %v453_v19 = vsel %vm352_vm2, %v452_v11, %v449_v8  ;;  %378 = vrot.lane.b32.xlu0 %v358_v10, %s938_s23  ;;  %v527_v21 = vpop.permute.xlu1 %526 }
 0x142   : > { %v457_v24 = vadd.f32 %v453_v19, %v429_v15  ;;  %v530_v25 = vrot.slane %v527_v21, 4  ;;  %v451_v26 = vpop.permute.xlu0 %450 }
 0x143   : > { %v454_v28 = vsel %vm352_vm2, %v452_v11, %v451_v26 }
 0x144   : > { %v531_v29 = vsel %vm352_vm2, %v530_v25, %v527_v21  ;;  %v458_v30 = vadd.f32 %v454_v28, %v430_v23  ;;  %461 = vrot.lane.b32.xlu1 %v457_v24, %s939_s28 }
 0x145   : > { %v535_v31 = vadd.f32 %v531_v29, %v509_v27  ;;  %v503_v32 = vpop.permute.xlu1 %502 }
 0x146   : > { %463 = vrot.lane.b32.xlu0 %v458_v30, %s939_s28  ;;  %v506_v34 = vsel %vm324_vm1, %v504_v63, %v503_v32  ;;  %v529_v36 = vpop.permute.xlu0 %528 }
 0x147   : > { %v510_v37 = vadd.f32 %v506_v34, %v484_v35  ;;  %v532_v39 = vsel %vm352_vm2, %v530_v25, %v529_v36  ;;  %v551_v40 = vcombine.high %v535_v31, %v535_v31 }
 0x148   : > { %552 = vrot.lane.b32.xlu1 %v535_v31, %s940_s29 }
 0x149   : > { %v536_v41 = vadd.f32 %v532_v39, %v510_v37 }
 0x14a   : > { %374 = vrot.lane.b32.xlu0 %v357_v33, %s938_s23 }
 0x14c   : > { %376 = vrot.lane.b32.xlu1 %v373_v38, %s938_s23 }
 0x14e   : > { %554 = vrot.lane.b32.xlu0 %v551_v40, %s940_s29 }
 0x150   : > { %556 = vrot.lane.b32.xlu1 %v536_v41, %s940_s29 }
 0x156   : > { %v274_v43 = vpop.permute.xlu1 %273 }
 0x157   : > { %v281_v56 = vrot.slane %v274_v43, %v1093_v18 }
 0x159   : > { %v283_v0 = vadd.f32 %v281_v56, %v1089_v5 }
 0x1b3   : > { %v379_v45 = vpop.permute.xlu0 %378 }
 0x1b6   : > { %v462_v48 = vpop.permute.xlu1 %461 }
 0x1b7   : > { %v465_v58 = vrot.slane %v462_v48, 4 }
 0x1b8   : > { %v464_v49 = vpop.permute.xlu0 %463 }
 0x1b9   : > { %v466_v57 = vrot.slane %v464_v49, 4 }
 0x1ba   : > { %v553_v52 = vpop.permute.xlu1 %552 }
 0x1bb   : > { %v467_v18 = vsel %vm322_vm0, %v465_v58, %v466_v57 }
 0x1bc   : > { %v375_v53 = vpop.permute.xlu0 %374  ;;  %v469_v7 = vsel %vm468_vm7, %v462_v48, %v467_v18 }
 0x1be   : > { %v377_v13 = vpop.permute.xlu1 %376 }
 0x1bf   : > { %v381_v59 = vsel %vm380_vm3, %v375_v53, %v377_v13  ;;  %v382_v60 = vsel %vm380_vm3, %v377_v13, %v379_v45 }
 0x1c0   : > { %v385_v61 = vsel %vm361_vm4, %v381_v59, 0.0  ;;  %v386_v62 = vsel %vm362_vm5, %v382_v60, 0.0  ;;  %v555_v63 = vpop.permute.xlu0 %554 }
 0x1c1   : > { %v389_v1 = vcombine.low %v385_v61, %v386_v62  ;;  %v559_v2 = vsel %vm558_vm6, %v553_v52, %v555_v63 }
 0x1c2   : > { %v557_v3 = vpop.permute.xlu1 %556  ;;  %v563_v8 = vsel %vm541_vm8, %v559_v2, 0.0 }
 0x1c3   : > { %v391_v4 = vadd.f32 %v389_v1, %v283_v0  ;;  %v560_v6 = vsel %vm558_vm6, %v555_v63, %v557_v3 }
 0x1c4   : > { %v564_v9 = vsel %vm542_vm9, %v560_v6, 0.0 }
 0x1c5   : > { %v471_v10 = vadd.f32 %v469_v7, %v391_v4  ;;  %v567_v5 = vcombine.low %v563_v8, %v564_v9 }
 0x1c7   : > { %v569_v11 = vadd.f32 %v567_v5, %v471_v10 }
 0x1c9   : > { %570 = vst [vmem:[%s230_s4] sm:$0xff] %v569_v11 }
 0x1ca   : > { %853 = shalt.err (!%p850_p6)
}
 0x1cb   : > { %s854_s5 = scalar_lea.hbm %s1146_s8, 128  ;;  %s858_s22 = scalar_lea.hbm %s1198_s3, 256 }
 0x1cc   : > { %p855_p4 = scmp.ne.s32.totalorder %s1146_s8, %s854_s5  ;;  %p859_p1 = scmp.lt.u32.totalorder %s1146_s8, %s1198_s3 }
 0x1cd   : > { %p860_p2 = scmp.lt.u32.totalorder %s858_s22, %s854_s5  ;;  %p862_p8 = scmp.lt.u32.totalorder %s854_s5, %s1146_s8 }
 0x1ce   : > { %p856_p10 = pnand %p855_p4, %p1207_p9 }
 0x1cf   : > { %p861_p5 = por %p860_p2, %p859_p1 }
 0x1d0   : > { %p857_p12 = pneg %p856_p10 }
 0x1d1   : > { %p863_p11 = por %p862_p8, %p861_p5 }
 0x1d3   : > { %p864_p0 = pnand %p863_p11, %p857_p12 }
 0x1d5   : > { %867 = shalt.err (!%p864_p0)
}
 0x1d6   : > { %723 = dma.vmem_to_hbm [thread:$0]  (%p1207_p9), %s1148_s11, 128, %s1146_s8, %s572_s10  }
 0x1d7 PF: > { %s600_s29 = sand.u32 1, %s902_s12   ;;  %p1208_p7 = scmp.ne.s32.totalorder %s1203_s27, 0 }
 0x1d8   : > { %p1209_p13 = scmp.ge.s32.totalorder %s922_s17, 2  ;;  %s601_s30 = scalar_lea.sflag [#allocation5], %s600_s29 }
 0x1da   : > { %p730_p3 = pnand %p1209_p13, %p1208_p7 }
 0x1dc   : > { %897 = dma.done.wait (!%p730_p3), %s601_s30, 128  }
 0x1dd   : > { %899 = vsyncadd (!%p730_p3), %s601_s30, 4294967168  ;;  %s19_s17 = sadd.s32 1, %s922_s17   ;;  %s1210_s12 = smov %s906_s13 }
 0x1de   : > { %p16_p6 = scmp.ge.s32.totalorder %s19_s17, 4   ;;  %s1211_s13 = smov %s910_s14 }
 0x1df   : > { %s1212_s14 = smov %s1018_s26  ;;  %s1213_s15 = smov %s918_s16 }
 0x1e0   : > { %s1214_s16 = smov %s1216_s20  ;;  %18 = sbr.rel (!%p16_p6) target bundleno = 6 (0x6), region = 83 }
 0x1e7   :  { %606 = vsyncpa [#allocation4], 1 }
 0x1e8   :  { %608 = vsyncpa [#allocation4 + $0x1], 1 }
 0x1e9   :  { %609 = vsyncpa [#allocation5], 1 }
 0x1ea   :  { %611 = vsyncpa [#allocation5 + $0x1], 1 }

</bundles_post_ra>
